<compile_context>
chip_gen: v7x
topology: tpu7x:2x2x1
jax: 0.10.0
libtpu: 0.0.40
codegen_flags: <defaults>
</compile_context>

<pallas_src>
import functools

import jax
import jax.numpy as jnp
from jax.experimental import pallas as pl
from jax.experimental.pallas import tpu as pltpu


HIDDEN = 100          # matches torch.nn.Linear(..., out_features=100)
LANE = 128            # TPU lane width; pad feature dims to this
DEFAULT_TM = 256      # batch-tile rows per grid step


def _round_up(n, m):
    return ((n + m - 1) // m) * m


def _mlp_kernel(x_ref, w1_ref, b1_ref, w2_ref, b2_ref, w3_ref, b3_ref, o_ref):
    """Full 3-layer forward for one (TM, *) batch tile; weights VMEM-resident."""
    x = x_ref[...]
    wt = w1_ref.dtype  # f32 or bf16; MXU accumulates in f32 either way

    # Hoist bias loads once (avoid re-materialized broadcasts).
    b1 = b1_ref[...]
    b2 = b2_ref[...]
    b3 = b3_ref[...]

    h1 = jnp.dot(x.astype(wt), w1_ref[...], preferred_element_type=jnp.float32)
    h1 = jnp.maximum(h1 + b1, 0.0)                      # f32 epilogue (VPU)

    h2 = jnp.dot(h1.astype(wt), w2_ref[...], preferred_element_type=jnp.float32)
    h2 = jnp.maximum(h2 + b2, 0.0)

    out = jnp.dot(h2.astype(wt), w3_ref[...], preferred_element_type=jnp.float32)
    o_ref[...] = (out + b3).astype(o_ref.dtype)


@functools.partial(jax.jit, static_argnames=("tm", "weights_dtype"))
def network_forward(x, params, *, tm=DEFAULT_TM, weights_dtype=jnp.float32):
    """Run the 3-layer MLP as a single batch-tiled Pallas call.

    x: (B, input_dim) float32
    params: dict with w1 (in,100), b1 (1,100), w2 (100,100), b2 (1,100),
            w3 (100,out), b3 (1,out)   (unpadded, PyTorch-equivalent values)
    weights_dtype: jnp.float32 (exact) or jnp.bfloat16 (v6e/v7x MXU fast path)
    """
    w1, b1 = params["w1"], params["b1"]
    w2, b2 = params["w2"], params["b2"]
    w3, b3 = params["w3"], params["b3"]

    B, in_dim = x.shape
    hid = w1.shape[1]
    out_dim = w3.shape[1]

    hid_p = _round_up(hid, LANE)       # 100 -> 128
    out_p = _round_up(out_dim, LANE)   # e.g. 16 -> 128

    # --- Zero-pad weights/biases to lane-aligned feature dims (exact). ---
    w1p = jnp.zeros((in_dim, hid_p), weights_dtype).at[:, :hid].set(
        w1.astype(weights_dtype))
    w2p = jnp.zeros((hid_p, hid_p), weights_dtype).at[:hid, :hid].set(
        w2.astype(weights_dtype))
    w3p = jnp.zeros((hid_p, out_p), weights_dtype).at[:hid, :out_dim].set(
        w3.astype(weights_dtype))
    b1p = jnp.zeros((1, hid_p), jnp.float32).at[:, :hid].set(b1)
    b2p = jnp.zeros((1, hid_p), jnp.float32).at[:, :hid].set(b2)
    b3p = jnp.zeros((1, out_p), jnp.float32).at[:, :out_dim].set(b3)

    # --- Tile the batch; pad rows so the grid divides evenly. ---
    tm_eff = min(tm, _round_up(B, 8))
    b_pad = _round_up(B, tm_eff)
    if b_pad != B:
        x = jnp.zeros((b_pad, in_dim), x.dtype).at[:B].set(x)
    n_tiles = pl.cdiv(b_pad, tm_eff)

    wbytes = jnp.dtype(weights_dtype).itemsize
    cost = pl.CostEstimate(
        flops=2 * b_pad * (in_dim * hid_p + hid_p * hid_p + hid_p * out_p),
        transcendentals=0,
        bytes_accessed=(b_pad * in_dim * 4 + b_pad * out_p * 4
                        + (in_dim * hid_p + hid_p * hid_p + hid_p * out_p) * wbytes
                        + (2 * hid_p + out_p) * 4),
    )

    const = lambda i: (0, 0)  # weights/biases: same block every grid step
    out_pad = pl.pallas_call(
        _mlp_kernel,
        out_shape=jax.ShapeDtypeStruct((b_pad, out_p), jnp.float32),
        grid=(n_tiles,),
        in_specs=[
            pl.BlockSpec((tm_eff, in_dim), lambda i: (i, 0)),   # x tile
            pl.BlockSpec((in_dim, hid_p), const),               # w1 (resident)
            pl.BlockSpec((1, hid_p), const),                    # b1
            pl.BlockSpec((hid_p, hid_p), const),                # w2
            pl.BlockSpec((1, hid_p), const),                    # b2
            pl.BlockSpec((hid_p, out_p), const),                # w3
            pl.BlockSpec((1, out_p), const),                    # b3
        ],
        out_specs=pl.BlockSpec((tm_eff, out_p), lambda i: (i, 0)),  # lane-dense
        compiler_params=pltpu.CompilerParams(
            dimension_semantics=("parallel",)),
        cost_estimate=cost,
    )(x, w1p, b1p, w2p, b2p, w3p, b3p)

    # Strip batch/output padding.
    return out_pad[:B, :out_dim]


def init_params(key, input_dim, output_dim):
    """Deterministic synthetic init (mimics torch.nn.Linear uniform fan-in init)."""
    ks = jax.random.split(key, 6)

    def linear(kw, kb, fan_in, fan_out):
        bound = 1.0 / jnp.sqrt(fan_in)
        w = jax.random.uniform(kw, (fan_in, fan_out), jnp.float32, -bound, bound)
        b = jax.random.uniform(kb, (1, fan_out), jnp.float32, -bound, bound)
        return w, b

    w1, b1 = linear(ks[0], ks[1], input_dim, HIDDEN)
    w2, b2 = linear(ks[2], ks[3], HIDDEN, HIDDEN)
    w3, b3 = linear(ks[4], ks[5], HIDDEN, output_dim)
    return {"w1": w1, "b1": b1, "w2": w2, "b2": b2, "w3": w3, "b3": b3}


def _reference(x, p):
    h1 = jnp.maximum(x @ p["w1"] + p["b1"], 0.0)
    h2 = jnp.maximum(h1 @ p["w2"] + p["b2"], 0.0)
    return h2 @ p["w3"] + p["b3"]


if __name__ == "__main__":
    key = jax.random.PRNGKey(0)
    k_x, k_p, k_big = jax.random.split(key, 3)

    input_dim = 32
    output_dim = 16
    params = init_params(k_p, input_dim, output_dim)

    # --- Small batch (typical inference shape), exact f32 path. ---
    batch = 8
    x = jax.random.normal(k_x, (batch, input_dim), jnp.float32)
    out = jax.block_until_ready(network_forward(x, params))
    ref = _reference(x, params)
    assert out.shape == (batch, output_dim)
    assert jnp.allclose(out, ref, atol=1e-4, rtol=1e-4), "f32 mismatch (small batch)"

    # --- Larger, non-multiple batch: exercises batch tiling + row padding. ---
    big_batch = 1000
    xb = jax.random.normal(k_big, (big_batch, input_dim), jnp.float32)
    out_b = jax.block_until_ready(network_forward(xb, params, tm=256))
    ref_b = _reference(xb, params)
    assert out_b.shape == (big_batch, output_dim)
    assert jnp.allclose(out_b, ref_b, atol=1e-4, rtol=1e-4), "f32 mismatch (tiled batch)"

    # --- bf16-weight fast path (v6e/v7x MXU); f32 accumulation + epilogue. ---
    out_bf = jax.block_until_ready(
        network_forward(xb, params, tm=256, weights_dtype=jnp.bfloat16))
    assert jnp.allclose(out_bf, ref_b, atol=5e-2, rtol=5e-2), "bf16 mismatch"

    print("KERNEL_OK")
</pallas_src>

<mosaic_0001>
module attributes {stable_mosaic.version = 11 : i64} {
  func.func @_mlp_kernel(%arg0: i32, %arg1: memref<8x32xf32, #tpu.memory_space<vmem>>, %arg2: memref<32x128xf32, #tpu.memory_space<vmem>>, %arg3: memref<1x128xf32, #tpu.memory_space<vmem>>, %arg4: memref<128x128xf32, #tpu.memory_space<vmem>>, %arg5: memref<1x128xf32, #tpu.memory_space<vmem>>, %arg6: memref<128x128xf32, #tpu.memory_space<vmem>>, %arg7: memref<1x128xf32, #tpu.memory_space<vmem>>, %arg8: memref<8x128xf32, #tpu.memory_space<vmem>>) attributes {dimension_semantics = [#tpu.dimension_semantics<parallel>], iteration_bounds = array<i64: 1>, scalar_prefetch = 0 : i64, scratch_operands = 0 : i64, tpu.core_type = #tpu.core_type<tc>, window_params = [{transform_indices = @transform_0, window_bounds = array<i64: 8, 32>}, {pipeline_mode = #tpu.pipeline_mode<synchronous>, transform_indices = @transform_1, window_bounds = array<i64: 32, 128>}, {pipeline_mode = #tpu.pipeline_mode<synchronous>, transform_indices = @transform_2, window_bounds = array<i64: 1, 128>}, {pipeline_mode = #tpu.pipeline_mode<synchronous>, transform_indices = @transform_3, window_bounds = array<i64: 128, 128>}, {pipeline_mode = #tpu.pipeline_mode<synchronous>, transform_indices = @transform_4, window_bounds = array<i64: 1, 128>}, {pipeline_mode = #tpu.pipeline_mode<synchronous>, transform_indices = @transform_5, window_bounds = array<i64: 128, 128>}, {pipeline_mode = #tpu.pipeline_mode<synchronous>, transform_indices = @transform_6, window_bounds = array<i64: 1, 128>}, {transform_indices = @transform_7, window_bounds = array<i64: 8, 128>}]} {
    %c0 = arith.constant 0 : index
    %c0_0 = arith.constant 0 : index
    %0 = vector.load %arg1[%c0, %c0_0] : memref<8x32xf32, #tpu.memory_space<vmem>>, vector<8x32xf32>
    %c0_1 = arith.constant 0 : index
    %c0_2 = arith.constant 0 : index
    %1 = vector.load %arg3[%c0_1, %c0_2] : memref<1x128xf32, #tpu.memory_space<vmem>>, vector<1x128xf32>
    %c0_3 = arith.constant 0 : index
    %c0_4 = arith.constant 0 : index
    %2 = vector.load %arg5[%c0_3, %c0_4] : memref<1x128xf32, #tpu.memory_space<vmem>>, vector<1x128xf32>
    %c0_5 = arith.constant 0 : index
    %c0_6 = arith.constant 0 : index
    %3 = vector.load %arg7[%c0_5, %c0_6] : memref<1x128xf32, #tpu.memory_space<vmem>>, vector<1x128xf32>
    %c0_7 = arith.constant 0 : index
    %c0_8 = arith.constant 0 : index
    %4 = vector.load %arg2[%c0_7, %c0_8] : memref<32x128xf32, #tpu.memory_space<vmem>>, vector<32x128xf32>
    %cst = arith.constant dense<0.000000e+00> : vector<8x128xf32>
    %5 = tpu.matmul %0, %4, %cst {dimension_numbers = #tpu.dot_dimension_numbers<[1], [0], [0], [1], [0, 0, 1, 1], [], []>} : vector<8x32xf32>, vector<32x128xf32>, vector<8x128xf32> -> vector<8x128xf32>
    %6 = vector.broadcast %1 : vector<1x128xf32> to vector<8x128xf32>
    %7 = arith.addf %5, %6 : vector<8x128xf32>
    %cst_9 = arith.constant 0.000000e+00 : f32
    %8 = vector.broadcast %cst_9 : f32 to vector<8x128xf32>
    %9 = arith.maximumf %7, %8 : vector<8x128xf32>
    %c0_10 = arith.constant 0 : index
    %c0_11 = arith.constant 0 : index
    %10 = vector.load %arg4[%c0_10, %c0_11] : memref<128x128xf32, #tpu.memory_space<vmem>>, vector<128x128xf32>
    %cst_12 = arith.constant dense<0.000000e+00> : vector<8x128xf32>
    %11 = tpu.matmul %9, %10, %cst_12 {dimension_numbers = #tpu.dot_dimension_numbers<[1], [0], [0], [1], [0, 0, 1, 1], [], []>} : vector<8x128xf32>, vector<128x128xf32>, vector<8x128xf32> -> vector<8x128xf32>
    %12 = vector.broadcast %2 : vector<1x128xf32> to vector<8x128xf32>
    %13 = arith.addf %11, %12 : vector<8x128xf32>
    %cst_13 = arith.constant 0.000000e+00 : f32
    %14 = vector.broadcast %cst_13 : f32 to vector<8x128xf32>
    %15 = arith.maximumf %13, %14 : vector<8x128xf32>
    %c0_14 = arith.constant 0 : index
    %c0_15 = arith.constant 0 : index
    %16 = vector.load %arg6[%c0_14, %c0_15] : memref<128x128xf32, #tpu.memory_space<vmem>>, vector<128x128xf32>
    %cst_16 = arith.constant dense<0.000000e+00> : vector<8x128xf32>
    %17 = tpu.matmul %15, %16, %cst_16 {dimension_numbers = #tpu.dot_dimension_numbers<[1], [0], [0], [1], [0, 0, 1, 1], [], []>} : vector<8x128xf32>, vector<128x128xf32>, vector<8x128xf32> -> vector<8x128xf32>
    %18 = vector.broadcast %3 : vector<1x128xf32> to vector<8x128xf32>
    %19 = arith.addf %17, %18 : vector<8x128xf32>
    %c0_17 = arith.constant 0 : index
    %c0_18 = arith.constant 0 : index
    %20 = vector.load %arg8[%c0_17, %c0_18] : memref<8x128xf32, #tpu.memory_space<vmem>>, vector<8x128xf32>
    tpu.vector_store %arg8[%c0_17, %c0_18], %19 {strides = array<i32>} : memref<8x128xf32, #tpu.memory_space<vmem>>, vector<8x128xf32>,
    return
  }
  func.func @transform_0(%arg0: i32) -> (i32, i32) {
    %c0_i32 = arith.constant 0 : i32
    %c0_i32_0 = arith.constant 0 : i32
    return %arg0, %c0_i32 : i32, i32
  }
  func.func @transform_1(%arg0: i32) -> (i32, i32) {
    %c0_i32 = arith.constant 0 : i32
    %c0_i32_0 = arith.constant 0 : i32
    %c0_i32_1 = arith.constant 0 : i32
    return %c0_i32, %c0_i32_0 : i32, i32
  }
  func.func @transform_2(%arg0: i32) -> (i32, i32) {
    %c0_i32 = arith.constant 0 : i32
    %c0_i32_0 = arith.constant 0 : i32
    %c0_i32_1 = arith.constant 0 : i32
    return %c0_i32, %c0_i32_0 : i32, i32
  }
  func.func @transform_3(%arg0: i32) -> (i32, i32) {
    %c0_i32 = arith.constant 0 : i32
    %c0_i32_0 = arith.constant 0 : i32
    %c0_i32_1 = arith.constant 0 : i32
    return %c0_i32, %c0_i32_0 : i32, i32
  }
  func.func @transform_4(%arg0: i32) -> (i32, i32) {
    %c0_i32 = arith.constant 0 : i32
    %c0_i32_0 = arith.constant 0 : i32
    %c0_i32_1 = arith.constant 0 : i32
    return %c0_i32, %c0_i32_0 : i32, i32
  }
  func.func @transform_5(%arg0: i32) -> (i32, i32) {
    %c0_i32 = arith.constant 0 : i32
    %c0_i32_0 = arith.constant 0 : i32
    %c0_i32_1 = arith.constant 0 : i32
    return %c0_i32, %c0_i32_0 : i32, i32
  }
  func.func @transform_6(%arg0: i32) -> (i32, i32) {
    %c0_i32 = arith.constant 0 : i32
    %c0_i32_0 = arith.constant 0 : i32
    %c0_i32_1 = arith.constant 0 : i32
    return %c0_i32, %c0_i32_0 : i32, i32
  }
  func.func @transform_7(%arg0: i32) -> (i32, i32) {
    %c0_i32 = arith.constant 0 : i32
    %c0_i32_0 = arith.constant 0 : i32
    return %arg0, %c0_i32 : i32, i32
  }
}

</mosaic_0001>

<bundles_post_ra>
// kernel: network_forward.1
= control target key start
LH: loop header
LB: loop body
LE: loop exit
PB: predicated region body
PF: predicated region fallthrough
CT: control target
= control target key end

     0   :  { %v522_v3 = vmov 0.0|0.0   ;;  %vm523_vm0 = vmmov 0   ;;  %v524_v6 = vmov 0.0   ;;  %s719_s0 = inlined_call_operand.vmem [shape: f32[8,32], index: 0, kind: input, shape index: {}]   ;;  %s720_s1 = inlined_call_operand.vmem [shape: f32[32,128], index: 1, kind: input, shape index: {}]   ;;  %s721_s2 = inlined_call_operand.vmem [shape: f32[1,128], index: 2, kind: input, shape index: {}]   ;;  %s722_s3 = inlined_call_operand.vmem [shape: f32[128,128], index: 3, kind: input, shape index: {}]   ;;  %s723_s4 = inlined_call_operand.vmem [shape: f32[1,128], index: 4, kind: input, shape index: {}]   ;;  %s724_s5 = inlined_call_operand.vmem [shape: f32[128,128], index: 5, kind: input, shape index: {}]   ;;  %s725_s6 = inlined_call_operand.vmem [shape: f32[1,128], index: 6, kind: input, shape index: {}]   ;;  %s726_s7 = inlined_call_operand.hbm [shape: f32[8,128], index: 7, kind: output, shape index: {}]  }
   0x1   :  { %v31_v0 = vld [vmem:[%s720_s1] sm:$0xff]  ;;  %v32_v1 = vld [vmem:[%s720_s1 + $0x8] sm:$0xff]  ;;  %v33_v2 = vld [vmem:[%s720_s1 + $0x10] sm:$0xff]  ;;  %440 = vmatprep.subr.bf16.mxu0 %v522_v3  ;;  %367 = vmatprep.mubr.msk.f32.mxu0 %vm523_vm0, %v524_v6 }
   0x2   :  { %v441_v4 = vpack.c.bf16 %v32_v1, %v31_v0  ;;  %v34_v5 = vld [vmem:[%s720_s1 + $0x18] sm:$0xff]  ;;  %v116_v7 = vld [vmem:[%s722_s3] sm:$0xff]  ;;  %446 = vmatprep.subr.bf16.mxu1 %v522_v3  ;;  %v117_v8 = vld [vmem:[%s722_s3 + $0x8] sm:$0xff]  ;;  %402 = vmatprep.mubr.msk.f32.mxu1 %vm523_vm0, %v524_v6 }
   0x3   :  { %v118_v9 = vld [vmem:[%s722_s3 + $0x10] sm:$0xff]  ;;  %v119_v10 = vld [vmem:[%s722_s3 + $0x18] sm:$0xff]  ;;  %v444_v11 = vpack.c.bf16 %v34_v5, %v33_v2  ;;  %v447_v12 = vpack.c.bf16 %v117_v8, %v116_v7  ;;  %v120_v14 = vld [vmem:[%s722_s3 + $0x20] sm:$0xff] }
   0x4   :  { %442 = vmatpush3.bf16.msra.mxu0 %v441_v4  ;;  %v450_v13 = vpack.c.bf16 %v119_v10, %v118_v9  ;;  %v121_v15 = vld [vmem:[%s722_s3 + $0x28] sm:$0xff] }
   0x5   :  { %443 = vmatprep.subr.bf16.mxu0 %v522_v3  ;;  %448 = vmatpush3.bf16.msra.mxu1 %v447_v12 }
   0x6   :  { %449 = vmatprep.subr.bf16.mxu1 %v522_v3 }
   0x7   :  { %12 = vsyncpa [#allocation3], 0  ;;  %v27_v16 = vld [vmem:[%s719_s0] sm:$0xff]  ;;  %vm41_vm1 = vcmask 261120   ;;  %v453_v17 = vpack.c.bf16 %v121_v15, %v120_v14  ;;  %v122_v18 = vld [vmem:[%s722_s3 + $0x30] sm:$0xff]  ;;  %s525_s26 = smov [#allocation2]  }
   0x8   :  { %445 = vmatpush3.bf16.msra.mxu0 %v444_v11  ;;  %v123_v19 = vld [vmem:[%s722_s3 + $0x38] sm:$0xff]  ;;  %v124_v21 = vld [vmem:[%s722_s3 + $0x40] sm:$0xff]  ;;  %v125_v22 = vld [vmem:[%s722_s3 + $0x48] sm:$0xff]  ;;  %s308_s27 = sshll.u32 %s525_s26, 4  ;;  %s309_s27 = int_to_ptr.vmem [resolvable:$true] %s308_s27 }
   0x9   :  { %470 = vmatprep.subr.bf16.mxu0 %v522_v3  ;;  %451 = vmatpush3.bf16.msra.mxu1 %v450_v13  ;;  %v456_v20 = vpack.c.bf16 %v123_v19, %v122_v18  ;;  %v459_v23 = vpack.c.bf16 %v125_v22, %v124_v21  ;;  %v126_v24 = vld [vmem:[%s722_s3 + $0x50] sm:$0xff]  ;;  %v127_v25 = vld [vmem:[%s722_s3 + $0x58] sm:$0xff]  ;;  %v128_v27 = vld [vmem:[%s722_s3 + $0x60] sm:$0xff]  ;;  %p503_p1 = scmp.lt.s32.totalorder %s309_s27, %s309_s27 }
   0xa   :  { %452 = vmatprep.subr.bf16.mxu1 %v522_v3  ;;  %v462_v26 = vpack.c.bf16 %v127_v25, %v126_v24  ;;  %v129_v28 = vld [vmem:[%s722_s3 + $0x68] sm:$0xff]  ;;  %v130_v30 = vld [vmem:[%s722_s3 + $0x70] sm:$0xff]  ;;  %v131_v31 = vld [vmem:[%s722_s3 + $0x78] sm:$0xff] }
   0xb   :  { %368 = vmatmul.mubr.msk.f32.vlgmr.msra.gmra.mrb[0].mxu0 %vm41_vm1, %v27_v16  ;;  %v465_v29 = vpack.c.bf16 %v129_v28, %v128_v27  ;;  %v468_v32 = vpack.c.bf16 %v131_v31, %v130_v30  ;;  %v209_v33 = vld [vmem:[%s724_s5] sm:$0xff]  ;;  %v210_v34 = vld [vmem:[%s724_s5 + $0x8] sm:$0xff]  ;;  %v211_v35 = vld [vmem:[%s724_s5 + $0x10] sm:$0xff] }
   0xc   :  { %437 = vmatprep.mubr.msk.f32.mxu0 %vm523_vm0, %v524_v6  ;;  %v471_v36 = vpack.c.bf16 %v210_v34, %v209_v33  ;;  %v212_v37 = vld [vmem:[%s724_s5 + $0x18] sm:$0xff]  ;;  %v213_v39 = vld [vmem:[%s724_s5 + $0x20] sm:$0xff]  ;;  %v214_v40 = vld [vmem:[%s724_s5 + $0x28] sm:$0xff] }
   0xd   :  { %454 = vmatpush3.bf16.msra.mxu1 %v453_v17  ;;  %v474_v38 = vpack.c.bf16 %v212_v37, %v211_v35  ;;  %v477_v41 = vpack.c.bf16 %v214_v40, %v213_v39  ;;  %v215_v42 = vld [vmem:[%s724_s5 + $0x30] sm:$0xff]  ;;  %v216_v43 = vld [vmem:[%s724_s5 + $0x38] sm:$0xff]  ;;  %v217_v45 = vld [vmem:[%s724_s5 + $0x40] sm:$0xff] }
   0xe   :  { %455 = vmatprep.subr.bf16.mxu1 %v522_v3  ;;  %472 = vmatpush3.bf16.msra.mxu0 %v471_v36  ;;  %v480_v44 = vpack.c.bf16 %v216_v43, %v215_v42  ;;  %v218_v46 = vld [vmem:[%s724_s5 + $0x48] sm:$0xff]  ;;  %v219_v48 = vld [vmem:[%s724_s5 + $0x50] sm:$0xff]  ;;  %v220_v49 = vld [vmem:[%s724_s5 + $0x58] sm:$0xff] }
   0xf   :  { %473 = vmatprep.subr.bf16.mxu0 %v522_v3  ;;  %v483_v47 = vpack.c.bf16 %v218_v46, %v217_v45  ;;  %v486_v50 = vpack.c.bf16 %v220_v49, %v219_v48  ;;  %v221_v51 = vld [vmem:[%s724_s5 + $0x60] sm:$0xff]  ;;  %v222_v52 = vld [vmem:[%s724_s5 + $0x68] sm:$0xff]  ;;  %v223_v59 = vld [vmem:[%s724_s5 + $0x70] sm:$0xff] }
  0x10   :  { %v489_v53 = vpack.c.bf16 %v222_v52, %v221_v51  ;;  %v316_v54 = vld [vmem:[%s721_s2] ss:$0 sm:$0xff]  ;;  %v224_v60 = vld [vmem:[%s724_s5 + $0x78] sm:$0xff]  ;;  %s498_s5 = scalar_lea.vmem %s309_s27, 128 }
  0x11   :  { %457 = vmatpush3.bf16.msra.mxu1 %v456_v20  ;;  %v492_v61 = vpack.c.bf16 %v224_v60, %v223_v59  ;;  %v318_v62 = vld [vmem:[%s723_s4] ss:$0 sm:$0xff]  ;;  %p499_p0 = scmp.ne.s32.totalorder %s309_s27, %s498_s5  ;;  %p504_p2 = scmp.lt.s32.totalorder %s498_s5, %s498_s5 }
  0x12   :  { %458 = vmatprep.subr.bf16.mxu1 %v522_v3  ;;  %475 = vmatpush3.bf16.msra.mxu0 %v474_v38 }
  0x13   :  { %476 = vmatprep.subr.bf16.mxu0 %v522_v3  ;;  %p505_p3 = por %p504_p2, %p503_p1 }
  0x15   :  { %460 = vmatpush3.bf16.msra.mxu1 %v459_v23  ;;  %p506_p4 = pnand %p505_p3, %p499_p0 }
  0x16   :  { %461 = vmatprep.subr.bf16.mxu1 %v522_v3  ;;  %478 = vmatpush3.bf16.msra.mxu0 %v477_v41 }
  0x17   :  { %479 = vmatprep.subr.bf16.mxu0 %v522_v3 }
  0x19   :  { %463 = vmatpush3.bf16.msra.mxu1 %v462_v26 }
  0x1a   :  { %464 = vmatprep.subr.bf16.mxu1 %v522_v3  ;;  %481 = vmatpush3.bf16.msra.mxu0 %v480_v44 }
  0x1b   :  { %482 = vmatprep.subr.bf16.mxu0 %v522_v3 }
  0x1d   :  { %466 = vmatpush3.bf16.msra.mxu1 %v465_v29 }
  0x1e   :  { %467 = vmatprep.subr.bf16.mxu1 %v522_v3  ;;  %484 = vmatpush3.bf16.msra.mxu0 %v483_v47 }
  0x1f   :  { %485 = vmatprep.subr.bf16.mxu0 %v522_v3 }
  0x21   :  { %469 = vmatpush3.bf16.msra.mxu1 %v468_v32 }
  0x22   :  { %487 = vmatpush3.bf16.msra.mxu0 %v486_v50 }
  0x23   :  { %488 = vmatprep.subr.bf16.mxu0 %v522_v3 }
  0x26   :  { %490 = vmatpush3.bf16.msra.mxu0 %v489_v53 }
  0x27   :  { %491 = vmatprep.subr.bf16.mxu0 %v522_v3  ;;  %v319_v3 = vld [vmem:[%s725_s6] ss:$0 sm:$0xff] }
  0x2a   :  { %493 = vmatpush3.bf16.msra.mxu0 %v492_v61 }
  0xde   :  { %v111_v55 = vpop.f32.mrb[0].mxu0 }
  0xdf   :  { %v112_v56 = vadd.f32 %v316_v54, %v111_v55  ;;  %v369_v57 = vpop.f32.mrb[1].mxu0 }
  0xe1   :  { %v115_v58 = vmax.f32 %v112_v56, 0.0 }
  0xe3   :  { %403 = vmatmul.mubr.f32.vlgmr.msra.gmra.mrb[0].mxu1 %v115_v58 }
 0x1b6   :  { %v204_v63 = vpop.f32.mrb[0].mxu1 }
 0x1b7   :  { %v205_v0 = vadd.f32 %v318_v62, %v204_v63  ;;  %v404_v1 = vpop.f32.mrb[1].mxu1 }
 0x1b9   :  { %v208_v2 = vmax.f32 %v205_v0, 0.0 }
 0x1bb   :  { %438 = vmatmul.mubr.f32.vlgmr.msra.gmra.mrb[2].mxu0 %v208_v2 }
 0x28e   :  { %v297_v4 = vpop.f32.mrb[2].mxu0 }
 0x28f   :  { %v298_v5 = vadd.f32 %v319_v3, %v297_v4  ;;  %v439_v6 = vpop.f32.mrb[3].mxu0 }
 0x291   :  { %301 = vst [vmem:[#allocation2] sm:$0xff] %v298_v5 }
 0x292   :  { %509 = shalt.err (!%p506_p4)
}
 0x293   :  { %s510_s29 = scalar_lea.hbm %s726_s7, 128 }
 0x294   :  { %p511_p5 = scmp.ne.s32.totalorder %s726_s7, %s510_s29  ;;  %p514_p6 = scmp.lt.u32.totalorder %s510_s29, %s726_s7 }
 0x296   :  { %p516_p7 = pnand %p514_p6, %p511_p5 }
 0x298   :  { %519 = shalt.err (!%p516_p7)
}
 0x299   :  { %311 = dma.vmem_to_hbm [thread:$0]  %s309_s27, 128, %s726_s7, [#allocation3]  }
 0x29a   :  { %520 = dma.done.wait [#allocation3], 128  }
 0x29b   :  { %521 = vsyncadd [#allocation3], 4294967168 }
 0x29c   :  { %315 = vsyncpa [#allocation3], 1 }

</bundles_post_ra>
